<compile_context>
chip_gen: v6e
topology: v6e:2x2x1
jax: 0.10.0
libtpu: 0.0.40
codegen_flags: <defaults>
</compile_context>

<pallas_src>
import math

import jax
import jax.numpy as jnp
from jax.experimental import pallas as pl
from jax.experimental.pallas import tpu as pltpu


def _flatten_dma_kernel(x_ref, o_ref, sem):
    # One HBM->HBM DMA of the whole contiguous buffer (no VMEM staging,
    # no grid, no lane/sublane slab constraints).
    cp = pltpu.make_async_copy(x_ref, o_ref, sem)
    cp.start()
    cp.wait()


def _flatten_out_shape(in_shape, dim):
    nd = len(in_shape)
    if dim < 0:
        dim += nd
    return tuple(in_shape[:dim]) + (int(math.prod(in_shape[dim:])),)


def flatten_pallas(x: jax.Array, dim: int, *, materialize: bool = False) -> jax.Array:
    """Equivalent of torch.Tensor.flatten(dim).

    materialize=False (default): pure-metadata reshape, zero bytes moved.
    materialize=True: force a fresh buffer via a single HBM->HBM DMA kernel.
    """
    out_shape = _flatten_out_shape(x.shape, dim)
    total = int(math.prod(out_shape)) if out_shape else 1

    # Fast path: flatten is metadata-only.  Also covers empty arrays.
    if not materialize or total == 0:
        return x.reshape(out_shape)

    # Keep src/dst shapes identical for the DMA; this reshape is metadata-only
    # on a contiguous buffer.
    x_view = x.reshape(out_shape)
    itemsize = jnp.dtype(x.dtype).itemsize

    return pl.pallas_call(
        _flatten_dma_kernel,
        out_shape=jax.ShapeDtypeStruct(out_shape, x.dtype),
        in_specs=[pl.BlockSpec(memory_space=pl.ANY)],
        out_specs=pl.BlockSpec(memory_space=pl.ANY),
        scratch_shapes=[pltpu.SemaphoreType.DMA(())],
        cost_estimate=pl.CostEstimate(
            flops=0,
            transcendentals=0,
            bytes_accessed=2 * total * itemsize,
        ),
    )(x_view)


class FlattenPallas:
    """Mirror of the PyTorch module (stores `dim`, applies flatten in forward)."""

    def __init__(self, dim: int, materialize: bool = False):
        self.dim = dim
        self.materialize = materialize

    def __call__(self, x: jax.Array) -> jax.Array:
        return flatten_pallas(x, self.dim, materialize=self.materialize)


if __name__ == "__main__":
    key = jax.random.PRNGKey(0)

    # Small NCHW activation, consistent with how Flatten is used in stack_pcbv2
    # (flatten conv features from dim=1 onward).
    B, C, H, W = 2, 4, 16, 16
    x = jax.random.normal(key, (B, C, H, W), dtype=jnp.float32)

    # Default (fast) path: pure metadata reshape.
    mod = FlattenPallas(dim=1)
    y_fast = jax.block_until_ready(mod(x))
    y_ref = x.reshape(B, C * H * W)
    assert y_fast.shape == (B, C * H * W), y_fast.shape
    assert y_fast.dtype == x.dtype
    assert bool(jnp.array_equal(y_fast, y_ref))

    # Materialized path: run the Pallas HBM->HBM DMA kernel once.
    y_copy = jax.block_until_ready(flatten_pallas(x, 1, materialize=True))
    assert y_copy.shape == (B, C * H * W)
    assert bool(jnp.array_equal(y_copy, y_ref))

    # dim=2 (3-D output) through the DMA kernel.
    y2 = jax.block_until_ready(flatten_pallas(x, 2, materialize=True))
    assert bool(jnp.array_equal(y2, x.reshape(B, C, H * W)))

    # Ragged total (no pad / slice passes needed anymore).
    key2 = jax.random.PRNGKey(1)
    x_odd = jax.random.normal(key2, (3, 5, 7), dtype=jnp.float32)
    y_odd = jax.block_until_ready(flatten_pallas(x_odd, 0, materialize=True))
    assert bool(jnp.array_equal(y_odd, x_odd.reshape(-1)))

    print("KERNEL_OK")
</pallas_src>

<mosaic_0001>
module attributes {stable_mosaic.version = 11 : i64} {
  func.func @_flatten_dma_kernel(%arg0: memref<2x1024xf32, #tpu.memory_space<any>>, %arg1: memref<2x1024xf32, #tpu.memory_space<any>>, %arg2: memref<!tpu.dma_semaphore, #tpu.memory_space<semaphore_mem>>) attributes {dimension_semantics = [], scalar_prefetch = 0 : i64, scratch_operands = 1 : i64, tpu.core_type = #tpu.core_type<tc>} {
    tpu.enqueue_dma source(%arg0 : memref<2x1024xf32, #tpu.memory_space<any>>) target(%arg1 : memref<2x1024xf32, #tpu.memory_space<any>>) target_semaphore(%arg2 : memref<!tpu.dma_semaphore, #tpu.memory_space<semaphore_mem>>)
    tpu.wait_dma2 semaphore(%arg2 : memref<!tpu.dma_semaphore, #tpu.memory_space<semaphore_mem>>) src(%arg0 : memref<2x1024xf32, #tpu.memory_space<any>>) dst(%arg1 : memref<2x1024xf32, #tpu.memory_space<any>>)
    return
  }
}

</mosaic_0001>

<bundles_post_ra>
// kernel: tpu_custom_call.1
= control target key start
LH: loop header
LB: loop body
LE: loop exit
PB: predicated region body
PF: predicated region fallthrough
CT: control target
= control target key end

     0   :  { %s29_s6 = smov [#allocation2]   ;;  %s30_s7 = smov 131072   ;;  %s48_s0 = inlined_call_operand.hbm [shape: f32[2,1024], index: 0, kind: input, shape index: {}]   ;;  %s49_s1 = inlined_call_operand.hbm [shape: f32[2,1024], index: 1, kind: output, shape index: {}]  }
   0x1   :  { %s31_s8 = smov 0  }
   0x2   :  { %12 = dma.general %s48_s0, 256, %s49_s1, %s29_s6, %s30_s7, [#allocation4], %s31_s8, 0  }
   0x3   :  { %27 = dma.done.wait [#allocation2], 256 }
   0x4   :  { %28 = vsyncadd [#allocation2], 4294967040 }
   0x5   :  { %17 = vsyncmov [#allocation2] }
   0x8   :  { %s18_s13 = vpop.sfrf %17 }
   0x9   :  { %p23_p0 = scmp.ne.s32.totalorder %s18_s13, 0 }
   0xb   :  { %22 = shalt.err (%p23_p0)  }

</bundles_post_ra>
